<compile_context>
chip_gen: v7x
topology: tpu7x:2x2x1
jax: 0.10.0
libtpu: 0.0.40
codegen_flags: <defaults>
</compile_context>

<pallas_src>
import functools

import jax
import jax.numpy as jnp
from jax.experimental import pallas as pl
from jax.experimental.pallas import tpu as pltpu

A_CONST = 0.49
EPS = float(jnp.finfo(jnp.float32).eps)

LANES = 128            # vreg lane width; last dim of every block
MAX_BLOCK_ROWS = 4096  # 4096 x 128 x 4B = 2 MiB/block (f32); x4 pipelined = 8 MiB
MIN_PALLAS_ELEMS = 8 * LANES  # below one (8,128) tile -> pure-XLA fallback


def _round_up(x, m):
    return ((x + m - 1) // m) * m


def soft_lrelu_ref(x):
    """Pure-JAX reference matching the PyTorch soft_lrelu (f32 math, cast back)."""
    xf = x.astype(jnp.float32)
    y = (1.0 - A_CONST) * xf + A_CONST * jnp.sqrt(xf * xf + EPS * EPS) - A_CONST * EPS
    return y.astype(x.dtype)


def _soft_lrelu_kernel(x_ref, o_ref):
    """Elementwise soft_lrelu on one (tb, 128) lane-dense tile.

    Loads/stores in the I/O dtype (e.g. bf16) and upcasts to f32 in-register:
    the cast is a free VPU op while narrow-dtype streaming halves HBM bytes.
    """
    x = x_ref[...].astype(jnp.float32)
    y = (1.0 - A_CONST) * x + A_CONST * jnp.sqrt(x * x + EPS * EPS) - A_CONST * EPS
    o_ref[...] = y.astype(o_ref.dtype)


@functools.partial(jax.jit, static_argnames=("donate_input",))
def slrelu_forward(x, donate_input=False):
    """Pallas-backed slReLU forward. Works for any input shape; float dtypes."""
    orig_shape = x.shape
    n = x.size

    # Tiny or lane-ragged inputs: the fused XLA elementwise path is already a
    # single read+write pass over HBM and avoids pad/slice round trips and
    # kernel launch/step overhead — skip the Pallas call entirely.
    if n < MIN_PALLAS_ELEMS or n % LANES != 0:
        return soft_lrelu_ref(x)

    rows = n // LANES
    # Contiguous reshape -> no HBM copy; keep the original dtype end-to-end.
    x2d = x.reshape(rows, LANES)

    # Row tile: as large as possible (<= 2 MiB for f32) to amortize the
    # ~0.35 us per-grid-step overhead, but split so there are >= 2 grid steps
    # whenever rows permit, keeping both v7x TensorCores busy.
    tb = max(8, min(MAX_BLOCK_ROWS, _round_up(pl.cdiv(rows, 2), 8)))
    grid = (pl.cdiv(rows, tb),)

    out2d = pl.pallas_call(
        _soft_lrelu_kernel,
        out_shape=jax.ShapeDtypeStruct((rows, LANES), x.dtype),
        grid_spec=pltpu.PrefetchScalarGridSpec(
            num_scalar_prefetch=0,
            grid=grid,
            in_specs=[pl.BlockSpec((tb, LANES), lambda i: (i, 0))],
            out_specs=pl.BlockSpec((tb, LANES), lambda i: (i, 0)),
        ),
        compiler_params=pltpu.CompilerParams(
            dimension_semantics=("parallel",)),
        # Only alias in place when the caller actually donates the input at
        # the jit boundary; otherwise XLA would insert a defensive copy that
        # costs an extra full HBM pass.
        input_output_aliases=({0: 0} if donate_input else {}),
    )(x2d)

    return out2d.reshape(orig_shape)


if __name__ == "__main__":
    key = jax.random.PRNGKey(0)
    k1, k2, k3 = jax.random.split(key, 3)

    # Primary test: small f32 tensor consistent with the module (elementwise).
    # 2*4*16*16 = 2048 elements -> 16 rows x 128 lanes -> Pallas path, grid of 2.
    x = jax.random.normal(k1, (2, 4, 16, 16), dtype=jnp.float32)
    out = jax.block_until_ready(slrelu_forward(x))
    ref = soft_lrelu_ref(x)
    assert out.shape == x.shape and out.dtype == x.dtype
    assert jnp.max(jnp.abs(out - ref)) < 1e-6, "Pallas kernel mismatch (f32)"

    # bf16 path: kernel streams bf16 and casts to f32 in-register.
    xb = jax.random.normal(k2, (8, 32, 128), dtype=jnp.bfloat16)
    outb = jax.block_until_ready(slrelu_forward(xb))
    refb = soft_lrelu_ref(xb)
    assert outb.shape == xb.shape and outb.dtype == jnp.bfloat16
    assert jnp.max(jnp.abs(outb.astype(jnp.float32) - refb.astype(jnp.float32))) < 1e-2, \
        "Pallas kernel mismatch (bf16)"

    # Ragged / tiny input -> pure-XLA fallback path.
    xr = jax.random.normal(k3, (3, 5, 7), dtype=jnp.float32)
    outr = jax.block_until_ready(slrelu_forward(xr))
    assert outr.shape == xr.shape and outr.dtype == xr.dtype
    assert jnp.max(jnp.abs(outr - soft_lrelu_ref(xr))) < 1e-6, "fallback mismatch"

    print("KERNEL_OK")
</pallas_src>

<mosaic_0001>
module attributes {stable_mosaic.version = 11 : i64} {
  func.func @_soft_lrelu_kernel(%arg0: i32, %arg1: memref<8x128xf32, #tpu.memory_space<vmem>>, %arg2: memref<8x128xf32, #tpu.memory_space<vmem>>) attributes {dimension_semantics = [#tpu.dimension_semantics<parallel>], iteration_bounds = array<i64: 2>, scalar_prefetch = 0 : i64, scratch_operands = 0 : i64, tpu.core_type = #tpu.core_type<tc>, window_params = [{transform_indices = @transform_0, window_bounds = array<i64: 8, 128>}, {transform_indices = @transform_1, window_bounds = array<i64: 8, 128>}]} {
    %c0 = arith.constant 0 : index
    %c0_0 = arith.constant 0 : index
    %0 = vector.load %arg1[%c0, %c0_0] : memref<8x128xf32, #tpu.memory_space<vmem>>, vector<8x128xf32>
    %cst = arith.constant 5.100000e-01 : f32
    %1 = vector.broadcast %cst : f32 to vector<8x128xf32>
    %2 = arith.mulf %1, %0 : vector<8x128xf32>
    %3 = arith.mulf %0, %0 : vector<8x128xf32>
    %cst_1 = arith.constant 1.42108547E-14 : f32
    %4 = vector.broadcast %cst_1 : f32 to vector<8x128xf32>
    %5 = arith.addf %3, %4 : vector<8x128xf32>
    %6 = math.sqrt %5 : vector<8x128xf32>
    %cst_2 = arith.constant 4.900000e-01 : f32
    %7 = vector.broadcast %cst_2 : f32 to vector<8x128xf32>
    %8 = arith.mulf %7, %6 : vector<8x128xf32>
    %9 = arith.addf %2, %8 : vector<8x128xf32>
    %cst_3 = arith.constant 5.8412553E-8 : f32
    %10 = vector.broadcast %cst_3 : f32 to vector<8x128xf32>
    %11 = arith.subf %9, %10 : vector<8x128xf32>
    %c0_4 = arith.constant 0 : index
    %c0_5 = arith.constant 0 : index
    %12 = vector.load %arg2[%c0_4, %c0_5] : memref<8x128xf32, #tpu.memory_space<vmem>>, vector<8x128xf32>
    tpu.vector_store %arg2[%c0_4, %c0_5], %11 {strides = array<i32>} : memref<8x128xf32, #tpu.memory_space<vmem>>, vector<8x128xf32>,
    return
  }
  func.func @transform_0(%arg0: i32) -> (i32, i32) {
    %c0_i32 = arith.constant 0 : i32
    %c0_i32_0 = arith.constant 0 : i32
    return %arg0, %c0_i32 : i32, i32
  }
  func.func @transform_1(%arg0: i32) -> (i32, i32) {
    %c0_i32 = arith.constant 0 : i32
    %c0_i32_0 = arith.constant 0 : i32
    return %arg0, %c0_i32 : i32, i32
  }
}

</mosaic_0001>

<bundles_post_ra>
// kernel: slrelu_forward.1
= control target key start
LH: loop header
LB: loop body
LE: loop exit
PB: predicated region body
PF: predicated region fallthrough
CT: control target
= control target key end

     0   :  { %s218_s6 = smov 0   ;;  %s235_s0 = inlined_call_operand.vmem [shape: f32[16,128], index: 0, kind: input, shape index: {}]   ;;  %s236_s1 = inlined_call_operand.vmem [shape: f32[16,128], index: 1, kind: output, shape index: {}]  }
   0x1 LB: > { %s180_s7 = sadd.s32 4294967295, %s206_s6   ;;  %p184_p0 = scmp.ge.s32.totalorder %s206_s6, 1  ;;  %s206_s6 = sphi %s218_s6, %s11_s6  }
   0x2   : > { %p86_p1 = scmp.lt.s32.totalorder %s206_s6, 3 }
   0x4   : > { %p87_p2 = pnand %p184_p0, %p86_p1 }
   0x5   : > { %p104_p3 = scmp.lt.s32.totalorder (!%p87_p2), %s180_s7, 1 }
   0x6   : > { %90 = sbr.rel (%p87_p2) target bundleno = 43 (0x2b), region = 24 }
   0xd   : > { %s238_s7 = smov (!%p104_p3, %s180_s7), 1 }
   0xe   : > { %s185_s8 = sshll.u32 %s238_s7, 3 }
   0xf   : > { %s107_s11 = scalar_lea.vmem %s235_s0, %s185_s8  ;;  %s111_s14 = scalar_lea.vmem %s236_s1, %s185_s8 }
  0x10   : > { %v112_v0 = vld [vmem:[%s107_s11] sm:$0xff] }
  0x11   : > { %v114_v1 = vmul.f32 %v112_v0, %v112_v0  ;;  %v113_v6 = vmul.f32 0.51, %v112_v0 }
  0x13   : > { %v115_v2 = vadd.f32 1.4210855e-14, %v114_v1 }
  0x15   : > { %198 = vrsqrt.f32 %v115_v2  ;;  %vm118_vm0 = vcmp.eq.f32.partialorder %v115_v2, inf  ;;  %v121_v4 = vand.u32 2147483648, %v115_v2  ;;  %vm120_vm1 = vcmp.eq.f32.partialorder %v115_v2, 0.0 }
  0x1f   : > { %v199_v3 = vpop.eup %198 }
  0x20   : > { %v117_v5 = vmul.f32 %v199_v3, %v115_v2 }
  0x22   : > { %v119_v7 = vsel %vm118_vm0, %v115_v2, %v117_v5 }
  0x23   : > { %v122_v8 = vsel %vm120_vm1, %v121_v4, %v119_v7 }
  0x24   : > { %v123_v9 = vmul.f32 0.49, %v122_v8 }
  0x26   : > { %v124_v10 = vadd.f32 %v123_v9, %v113_v6 }
  0x28   : > { %v187_v11 = vadd.f32 -5.8412553e-08, %v124_v10 }
  0x2a   : > { %126 = vst [vmem:[%s111_s14] sm:$0xff] %v187_v11 }
  0x2b PF: > { %s11_s6 = sadd.s32 1, %s206_s6  }
  0x2c   : > { %p8_p4 = scmp.ge.s32.totalorder %s11_s6, 4  }
  0x2e   :  { %10 = sbr.rel (!%p8_p4) target bundleno = 1 (0x1), region = 54 }

</bundles_post_ra>
